<compile_context>
chip_gen: v5e
topology: v5e:2x2
jax: 0.10.0
libtpu: 0.0.40
codegen_flags: <defaults>
</compile_context>

<pallas_src>
import math

import jax
import jax.numpy as jnp
from jax import lax
from jax.experimental import pallas as pl
from jax.experimental.pallas import tpu as pltpu

# Problem geometry implied by the reference forward pass.
SQ, SK, DV = 28, 16, 28
# Padded, sublane-aligned packing geometry.
ACT_ROWS = 64   # q @ rows 0:28 (28:32 zero) | k @ 32:48 | v @ 48:64
W_ROWS = 56     # [w1;w3] @ 0:32 | w2 @ 32:40 | w6 @ 40:48 | w7 @ 48:56
OUT_ROWS = 48   # (o1_top + o2) @ 0:28 (28:32 zero) | o1_bot @ 32:48


def _dot_nt(a, b):
    """y = a @ b.T (nn.Linear with bias=False; b is (out_features, in_features))."""
    return lax.dot_general(a, b, (((1,), (1,)), ((), ())),
                           preferred_element_type=jnp.float32)


def model_kernel(act_ref, w_ref, o_ref):
    act = act_ref[...]                 # (64, 32) packed activations
    W = w_ref[...]                     # (56, 32) packed weights

    q = act[0:32, :]                   # (32, 32)  rows 28:32 are zero padding
    k = act[32:48, :]                  # (16, 32)  cols 16:32 are zero padding
    v = act[48:64, :]                  # (16, 32)  cols 28:32 are zero padding

    w13 = W[0:32, :]                   # (32, 32)  rows 0:16 = w1, 16:32 = w3
    w2f = W[32:40, :]                  # (8, 32)   [w2 | 0]
    w6f = W[40:48, :]                  # (8, 32)   [w6 | 0]
    w7f = W[48:56, :]                  # (8, 32)   [w7 | 0]

    # Fused linear1 + linear3 (shared LHS, independent output columns).
    q13 = _dot_nt(q, w13)              # (32, 32): cols 0:16 = q1, 16:32 = q3
    # linear2 over the full 32-wide block; zero-padded weight cols kill q3.
    q2 = _dot_nt(q13, w2f)             # (32, 8)
    # linear6(k); zero-padded k cols / w6 cols contribute nothing.
    k3 = _dot_nt(k, w6f)               # (16, 8)
    # TODO(synk): k1 = linear4(k) only feeds the (static) mask row count and
    # k2 = linear5(k1) is dead AND shape-invalid in the reference; both omitted.

    # attn_weight = softmax(mask(q2 @ k3.T / sqrt(8)))
    attn = _dot_nt(q2, k3) * jnp.float32(1.0 / math.sqrt(8.0))   # (32, 16)
    rows = lax.broadcasted_iota(jnp.int32, attn.shape, 0)
    cols = lax.broadcasted_iota(jnp.int32, attn.shape, 1)
    # Finite large-negative mask value; every real row keeps col 0 unmasked.
    attn = jnp.where(cols > rows, jnp.float32(-1e30), attn)
    m = jnp.max(attn, axis=-1, keepdims=True)
    e = jnp.exp(attn - m)
    p = e * pl.reciprocal(jnp.sum(e, axis=-1, keepdims=True), approx=True)
    # Zero the 4 padding query rows so they stay zero downstream (they enter
    # the transposed linear7 terms through a contraction over rows).
    p = jnp.where(rows < SQ, p, jnp.float32(0.0))                # (32, 16)

    out = jnp.dot(p, v, preferred_element_type=jnp.float32)      # (32, 32); rows/cols 28:32 zero

    # linear7 terms, no ragged concats / large transposes:
    #   o1_top = out   @ w7.T                       -> t1   rows 0:28
    #   o2     = out.T @ w7.T = (w7 @ out).T        -> s2.T rows 0:28
    #   o1_bot = q3.T  @ w7.T = (w7 @ q3).T         -> cols 16:32 of (w7 @ q13), transposed
    t1 = _dot_nt(out, w7f)                                       # (32, 8)
    s2 = jnp.dot(w7f, out, preferred_element_type=jnp.float32)   # (8, 32)
    sb = jnp.dot(w7f, q13, preferred_element_type=jnp.float32)   # (8, 32)

    top = t1 + s2.T                    # (32, 8): rows 0:28 = o1_top + o2, rows 28:32 = 0
    bot = sb.T[16:32, :]               # (16, 8) = o1_bot (sublane-aligned slice)

    # Two sublane-aligned stores covering the full (48, 8) block.
    o_ref[0:32, :] = top
    o_ref[32:48, :] = bot


def pack_weights(params):
    """Pack the 5 live weight matrices into one (56, 32) f32 slab (1 resident DMA)."""
    def pad32(w):
        return jnp.pad(w, ((0, 0), (0, 32 - w.shape[1])))
    return jnp.concatenate(
        [params["w1"],            # (16, 32)
         params["w3"],            # (16, 32)
         pad32(params["w2"]),     # (8, 32)
         pad32(params["w6"]),     # (8, 32)
         pad32(params["w7"])],    # (8, 32)
        axis=0).astype(jnp.float32)


def pack_activations(q, k, v):
    """Pack q/k/v into one zero-padded (B, 64, 32) slab (1 input DMA per grid step)."""
    q_pad = jnp.pad(q, ((0, 0), (0, 32 - SQ), (0, 0)))           # (B, 32, 32)
    k_pad = jnp.pad(k, ((0, 0), (0, 0), (0, 32 - SK)))           # (B, 16, 32)
    v_pad = jnp.pad(v, ((0, 0), (0, 0), (0, 32 - DV)))           # (B, 16, 32)
    return jnp.concatenate([q_pad, k_pad, v_pad], axis=1).astype(jnp.float32)


@jax.jit
def model_forward(q, k, v, w_packed):
    """Batched forward: q (B,28,32), k (B,16,16), v (B,16,28) -> (B,44,8)."""
    b = q.shape[0]
    act = pack_activations(q, k, v)
    raw = pl.pallas_call(
        model_kernel,
        out_shape=jax.ShapeDtypeStruct((b, OUT_ROWS, 8), jnp.float32),
        grid=(b,),
        in_specs=[
            pl.BlockSpec((None, ACT_ROWS, 32), lambda i: (i, 0, 0)),
            pl.BlockSpec((W_ROWS, 32), lambda i: (0, 0)),   # weights stay resident
        ],
        out_specs=pl.BlockSpec((None, OUT_ROWS, 8), lambda i: (i, 0, 0)),
        compiler_params=pltpu.CompilerParams(
            dimension_semantics=("parallel",)),   # shards batch across TCs on v7x
    )(act, w_packed)
    # Splice out the 4 alignment-padding rows -> (B, 44, 8).
    return jnp.concatenate([raw[:, 0:SQ, :], raw[:, 32:48, :]], axis=1)


def reference_forward_single(q, k, v, params):
    """Pure-JAX (f32) mirror of the kernel math for a single instance."""
    w1, w2, w3, w6, w7 = (params["w1"], params["w2"], params["w3"],
                          params["w6"], params["w7"])
    q1 = q @ w1.T
    q2 = q1 @ w2.T
    q3 = q @ w3.T
    k3 = k @ w6.T
    attn = (q2 @ k3.T) / math.sqrt(q2.shape[-1])
    mask = jnp.triu(jnp.ones((q.shape[0], k.shape[0]), bool), k=1)
    attn = jnp.where(mask, -jnp.inf, attn)
    p = jax.nn.softmax(attn, axis=-1)
    out = p @ v
    o1_top = out @ w7.T
    o1_bot = q3.T @ w7.T
    o2 = out.T @ w7.T
    # The reference's `o1 + o2` is shape-invalid ((44,8)+(28,8)); o2 is added
    # to the first 28 rows (same convention as the kernel).
    return jnp.concatenate([o1_top + o2, o1_bot], axis=0)


def init_params(key):
    ks = jax.random.split(key, 7)

    def lin(kk, out_f, in_f):
        bound = 1.0 / math.sqrt(in_f)
        return jax.random.uniform(kk, (out_f, in_f), jnp.float32, -bound, bound)

    return {
        "w1": lin(ks[0], 16, 32),
        "w2": lin(ks[1], 8, 16),
        "w3": lin(ks[2], 16, 32),
        "w4": lin(ks[3], 8, 16),   # linear4 (only its row count feeds the mask)
        "w5": lin(ks[4], 16, 32),  # linear5 (dead / shape-invalid in reference)
        "w6": lin(ks[5], 8, 16),
        "w7": lin(ks[6], 8, 28),
    }


if __name__ == "__main__":
    key = jax.random.PRNGKey(0)
    kq, kk, kv, kp = jax.random.split(key, 4)

    B = 4
    q = jax.random.normal(kq, (B, SQ, 32), jnp.float32)
    k = jax.random.normal(kk, (B, SK, 16), jnp.float32)
    v = jax.random.normal(kv, (B, SK, DV), jnp.float32)
    params = init_params(kp)
    w_packed = pack_weights(params)

    out = model_forward(q, k, v, w_packed)
    out = jax.block_until_ready(out)

    ref = jax.vmap(reference_forward_single, in_axes=(0, 0, 0, None))(q, k, v, params)
    assert out.shape == (B, SQ + SK, 8), out.shape
    err = float(jnp.max(jnp.abs(out - ref)))
    assert jnp.allclose(out, ref, atol=1e-2, rtol=1e-2), err

    print("KERNEL_OK")
</pallas_src>

<mosaic_0001>
module attributes {stable_mosaic.version = 11 : i64} {
  func.func @model_kernel(%arg0: i32, %arg1: memref<1x64x32xf32, #tpu.memory_space<vmem>>, %arg2: memref<56x32xf32, #tpu.memory_space<vmem>>, %arg3: memref<1x48x8xf32, #tpu.memory_space<vmem>>) attributes {dimension_semantics = [#tpu.dimension_semantics<parallel>], iteration_bounds = array<i64: 4>, scalar_prefetch = 0 : i64, scratch_operands = 0 : i64, tpu.core_type = #tpu.core_type<tc>, window_params = [{transform_indices = @transform_0, window_bounds = array<i64: 1, 64, 32>}, {pipeline_mode = #tpu.pipeline_mode<synchronous>, transform_indices = @transform_1, window_bounds = array<i64: 56, 32>}, {transform_indices = @transform_2, window_bounds = array<i64: 1, 48, 8>}]} {
    %c0 = arith.constant 0 : index
    %c0_0 = arith.constant 0 : index
    %c0_1 = arith.constant 0 : index
    %0 = vector.load %arg1[%c0, %c0_0, %c0_1] : memref<1x64x32xf32, #tpu.memory_space<vmem>>, vector<1x64x32xf32>
    %1 = vector.shape_cast %0 : vector<1x64x32xf32> to vector<64x32xf32>
    %c0_2 = arith.constant 0 : index
    %c0_3 = arith.constant 0 : index
    %2 = vector.load %arg2[%c0_2, %c0_3] : memref<56x32xf32, #tpu.memory_space<vmem>>, vector<56x32xf32>
    %3 = vector.extract_strided_slice %1 {offsets = [0, 0], sizes = [32, 32], strides = [1, 1]} : vector<64x32xf32> to vector<32x32xf32>
    %4 = vector.extract_strided_slice %1 {offsets = [32, 0], sizes = [16, 32], strides = [1, 1]} : vector<64x32xf32> to vector<16x32xf32>
    %5 = vector.extract_strided_slice %1 {offsets = [48, 0], sizes = [16, 32], strides = [1, 1]} : vector<64x32xf32> to vector<16x32xf32>
    %6 = vector.extract_strided_slice %2 {offsets = [0, 0], sizes = [32, 32], strides = [1, 1]} : vector<56x32xf32> to vector<32x32xf32>
    %7 = vector.extract_strided_slice %2 {offsets = [32, 0], sizes = [8, 32], strides = [1, 1]} : vector<56x32xf32> to vector<8x32xf32>
    %8 = vector.extract_strided_slice %2 {offsets = [40, 0], sizes = [8, 32], strides = [1, 1]} : vector<56x32xf32> to vector<8x32xf32>
    %9 = vector.extract_strided_slice %2 {offsets = [48, 0], sizes = [8, 32], strides = [1, 1]} : vector<56x32xf32> to vector<8x32xf32>
    %cst = arith.constant dense<0.000000e+00> : vector<32x32xf32>
    %10 = tpu.matmul %3, %6, %cst {dimension_numbers = #tpu.dot_dimension_numbers<[1], [1], [0], [0], [0, 0, 1, 0], [], []>} : vector<32x32xf32>, vector<32x32xf32>, vector<32x32xf32> -> vector<32x32xf32>
    %cst_4 = arith.constant dense<0.000000e+00> : vector<32x8xf32>
    %11 = tpu.matmul %10, %7, %cst_4 {dimension_numbers = #tpu.dot_dimension_numbers<[1], [1], [0], [0], [0, 0, 1, 0], [], []>} : vector<32x32xf32>, vector<8x32xf32>, vector<32x8xf32> -> vector<32x8xf32>
    %cst_5 = arith.constant dense<0.000000e+00> : vector<16x8xf32>
    %12 = tpu.matmul %4, %8, %cst_5 {dimension_numbers = #tpu.dot_dimension_numbers<[1], [1], [0], [0], [0, 0, 1, 0], [], []>} : vector<16x32xf32>, vector<8x32xf32>, vector<16x8xf32> -> vector<16x8xf32>
    %cst_6 = arith.constant dense<0.000000e+00> : vector<32x16xf32>
    %13 = tpu.matmul %11, %12, %cst_6 {dimension_numbers = #tpu.dot_dimension_numbers<[1], [1], [0], [0], [0, 0, 1, 0], [], []>} : vector<32x8xf32>, vector<16x8xf32>, vector<32x16xf32> -> vector<32x16xf32>
    %cst_7 = arith.constant 0.353553385 : f32
    %14 = vector.broadcast %cst_7 : f32 to vector<32x16xf32>
    %15 = arith.mulf %13, %14 : vector<32x16xf32>
    %16 = tpu.iota {dimensions = array<i32: 0>} : vector<32x16xi32>
    %17 = tpu.iota {dimensions = array<i32: 1>} : vector<32x16xi32>
    %18 = arith.cmpi sgt, %17, %16 : vector<32x16xi32>
    %cst_8 = arith.constant -1.000000e+30 : f32
    %19 = vector.broadcast %cst_8 : f32 to vector<32x16xf32>
    %20 = arith.select %18, %19, %15 : vector<32x16xi1>, vector<32x16xf32>
    %cst_9 = arith.constant dense<0xFF800000> : vector<32xf32>
    %21 = vector.multi_reduction <maximumf>, %20, %cst_9 [1] : vector<32x16xf32> to vector<32xf32>
    %22 = vector.shape_cast %21 : vector<32xf32> to vector<32x1xf32>
    %23 = vector.broadcast %22 : vector<32x1xf32> to vector<32x16xf32>
    %24 = arith.subf %20, %23 : vector<32x16xf32>
    %25 = math.exp %24 : vector<32x16xf32>
    %cst_10 = arith.constant dense<0.000000e+00> : vector<32xf32>
    %26 = vector.multi_reduction <add>, %25, %cst_10 [1] : vector<32x16xf32> to vector<32xf32>
    %27 = vector.shape_cast %26 : vector<32xf32> to vector<32x1xf32>
    %28 = tpu.reciprocal %27 {approx = true} : vector<32x1xf32> -> vector<32x1xf32>
    %29 = vector.broadcast %28 : vector<32x1xf32> to vector<32x16xf32>
    %30 = arith.mulf %25, %29 : vector<32x16xf32>
    %c28_i32 = arith.constant 28 : i32
    %31 = vector.broadcast %c28_i32 : i32 to vector<32x16xi32>
    %32 = arith.cmpi slt, %16, %31 : vector<32x16xi32>
    %cst_11 = arith.constant 0.000000e+00 : f32
    %33 = vector.broadcast %cst_11 : f32 to vector<32x16xf32>
    %34 = arith.select %32, %30, %33 : vector<32x16xi1>, vector<32x16xf32>
    %cst_12 = arith.constant dense<0.000000e+00> : vector<32x32xf32>
    %35 = tpu.matmul %34, %5, %cst_12 {dimension_numbers = #tpu.dot_dimension_numbers<[1], [0], [0], [1], [0, 0, 1, 1], [], []>} : vector<32x16xf32>, vector<16x32xf32>, vector<32x32xf32> -> vector<32x32xf32>
    %cst_13 = arith.constant dense<0.000000e+00> : vector<32x8xf32>
    %36 = tpu.matmul %35, %9, %cst_13 {dimension_numbers = #tpu.dot_dimension_numbers<[1], [1], [0], [0], [0, 0, 1, 0], [], []>} : vector<32x32xf32>, vector<8x32xf32>, vector<32x8xf32> -> vector<32x8xf32>
    %cst_14 = arith.constant dense<0.000000e+00> : vector<8x32xf32>
    %37 = tpu.matmul %9, %35, %cst_14 {dimension_numbers = #tpu.dot_dimension_numbers<[1], [0], [0], [1], [0, 0, 1, 1], [], []>} : vector<8x32xf32>, vector<32x32xf32>, vector<8x32xf32> -> vector<8x32xf32>
    %cst_15 = arith.constant dense<0.000000e+00> : vector<8x32xf32>
    %38 = tpu.matmul %9, %10, %cst_15 {dimension_numbers = #tpu.dot_dimension_numbers<[1], [0], [0], [1], [0, 0, 1, 1], [], []>} : vector<8x32xf32>, vector<32x32xf32>, vector<8x32xf32> -> vector<8x32xf32>
    %39 = tpu.transpose %37, [1, 0] : vector<8x32xf32> -> vector<32x8xf32>
    %40 = arith.addf %36, %39 : vector<32x8xf32>
    %41 = tpu.transpose %38, [1, 0] : vector<8x32xf32> -> vector<32x8xf32>
    %42 = vector.extract_strided_slice %41 {offsets = [16, 0], sizes = [16, 8], strides = [1, 1]} : vector<32x8xf32> to vector<16x8xf32>
    %c0_16 = arith.constant 0 : index
    %c0_17 = arith.constant 0 : index
    %c0_18 = arith.constant 0 : index
    %43 = vector.load %arg3[%c0_16, %c0_17, %c0_18] : memref<1x48x8xf32, #tpu.memory_space<vmem>>, vector<1x32x8xf32>
    %44 = vector.shape_cast %43 : vector<1x32x8xf32> to vector<32x8xf32>
    %45 = vector.shape_cast %40 : vector<32x8xf32> to vector<1x32x8xf32>
    tpu.vector_store %arg3[%c0_16, %c0_17, %c0_18], %45 {strides = array<i32>} : memref<1x48x8xf32, #tpu.memory_space<vmem>>, vector<1x32x8xf32>,
    %c0_19 = arith.constant 0 : index
    %c32 = arith.constant 32 : index
    %c0_20 = arith.constant 0 : index
    %46 = vector.load %arg3[%c0_19, %c32, %c0_20] : memref<1x48x8xf32, #tpu.memory_space<vmem>>, vector<1x16x8xf32>
    %47 = vector.shape_cast %46 : vector<1x16x8xf32> to vector<16x8xf32>
    %48 = vector.shape_cast %42 : vector<16x8xf32> to vector<1x16x8xf32>
    tpu.vector_store %arg3[%c0_19, %c32, %c0_20], %48 {strides = array<i32>} : memref<1x48x8xf32, #tpu.memory_space<vmem>>, vector<1x16x8xf32>,
    return
  }
  func.func @transform_0(%arg0: i32) -> (i32, i32, i32) {
    %c0_i32 = arith.constant 0 : i32
    %c0_i32_0 = arith.constant 0 : i32
    %c0_i32_1 = arith.constant 0 : i32
    return %arg0, %c0_i32, %c0_i32_0 : i32, i32, i32
  }
  func.func @transform_1(%arg0: i32) -> (i32, i32) {
    %c0_i32 = arith.constant 0 : i32
    %c0_i32_0 = arith.constant 0 : i32
    %c0_i32_1 = arith.constant 0 : i32
    return %c0_i32, %c0_i32_0 : i32, i32
  }
  func.func @transform_2(%arg0: i32) -> (i32, i32, i32) {
    %c0_i32 = arith.constant 0 : i32
    %c0_i32_0 = arith.constant 0 : i32
    %c0_i32_1 = arith.constant 0 : i32
    return %arg0, %c0_i32, %c0_i32_0 : i32, i32, i32
  }
}

</mosaic_0001>

<bundles_post_ra>
// kernel: model_forward.1
= control target key start
LH: loop header
LB: loop body
LE: loop exit
PB: predicated region body
PF: predicated region fallthrough
CT: control target
= control target key end

     0   :  { %s754_s9 = smov 0   ;;  %s855_s0 = inlined_call_operand.vmem [shape: f32[4,64,32], index: 0, kind: input, shape index: {}]   ;;  %s856_s1 = inlined_call_operand.vmem [shape: f32[56,32], index: 1, kind: input, shape index: {}]   ;;  %s857_s2 = inlined_call_operand.vmem [shape: f32[4,48,8], index: 2, kind: output, shape index: {}]  }
   0x1 LB: > { %s659_s10 = sadd.s32 4294967295, %s737_s9   ;;  %p663_p0 = scmp.ge.s32.totalorder %s737_s9, 1  ;;  %s737_s9 = sphi %s754_s9, %s12_s9  }
   0x2   : > { %p112_p1 = scmp.lt.s32.totalorder %s737_s9, 5 }
   0x4   : > { %p113_p2 = pnand %p663_p0, %p112_p1 }
   0x5   : > { %p134_p3 = scmp.lt.s32.totalorder (!%p113_p2), %s659_s10, 3 }
   0x6   : > { %116 = sbr.rel (%p113_p2) target bundleno = 1145 (0x479), region = 28 }
   0xb   : > { %v155_v0 = vld [vmem:[%s856_s1 + $0x18] sm:$0xff]  ;;  %vm159_vm0 = vcmask 261120   ;;  %v157_v1 = vld [vmem:[%s856_s1 + $0x28] sm:$0xff]  ;;  %v154_v2 = vld [vmem:[%s856_s1 + $0x10] sm:$0xff]  ;;  %s859_s10 = smov (!%p134_p3, %s659_s10), 3  ;;  %vm289_vm1 = vcmask 64512   ;;  %v341_v22 = vlaneseq }
   0xc   : > { %667 = vmatpush.xpose.msk.msra.mxu0 %vm159_vm0, %v155_v0  ;;  %680 = vmatpush.xpose.msk.msra.mxu2 %vm159_vm0, %v157_v1  ;;  %s702_s17 = sshll.u32 %s859_s10, 6  ;;  %v153_v3 = vld [vmem:[%s856_s1 + $0x8] sm:$0xff]  ;;  %v156_v5 = vld [vmem:[%s856_s1 + $0x20] sm:$0xff]  ;;  %vm356_vm3 = vcmask 130048   ;;  %s705_s29 = smul.u32 48, %s859_s10 }
   0xd   : > { %s780_s20 = scalar_lea.vmem %s855_s0, %s702_s17  ;;  %703 = vmatpush.xpose.msk.msra.mxu1 %vm159_vm0, %v156_v5  ;;  %v152_v6 = vld [vmem:[%s856_s1] sm:$0xff]  ;;  %704 = vmatpush.xpose.msk.msra.mxu3 %vm159_vm0, %v156_v5  ;;  %v342_v23 = vshrl.u32 %v341_v22, 7  ;;  %v347_v24 = vand.u32 127, %v341_v22 }
   0xe   : > { %v148_v4 = vld [vmem:[%s780_s20 + $0x20] sm:$0xff]  ;;  %v149_v7 = vld [vmem:[%s780_s20 + $0x28] sm:$0xff]  ;;  %v146_v10 = vld [vmem:[%s780_s20 + $0x10] sm:$0xff]  ;;  %s143_s4 = scalar_lea.vmem %s857_s2, %s705_s29 }
   0xf   : > { %681 = vmatmul.msk.f32.vlgmr.msra.gmra.mxu2 %vm159_vm0, %v148_v4  ;;  %v144_v8 = vld [vmem:[%s780_s20] sm:$0xff]  ;;  %v145_v9 = vld [vmem:[%s780_s20 + $0x8] sm:$0xff]  ;;  %v147_v11 = vld [vmem:[%s780_s20 + $0x18] sm:$0xff]  ;;  %vm348_vm2 = vcmp.gt.s32.totalorder %v347_v24, %v342_v23  ;;  %v343_v29 = vadd.s32 8, %v342_v23  ;;  %v344_v34 = vadd.s32 16, %v342_v23  ;;  %v345_v39 = vadd.s32 24, %v342_v23 }
  0x10   : > { %668 = vmatpush.xpose.msk.msra.mxu0 %vm159_vm0, %v154_v2  ;;  %v151_v0 = vld [vmem:[%s780_s20 + $0x38] sm:$0xff]  ;;  %v150_v1 = vld [vmem:[%s780_s20 + $0x30] sm:$0xff] }
  0x11   : > { %vm349_vm4 = vcmp.gt.s32.totalorder %v347_v24, %v343_v29  ;;  %vm350_vm5 = vcmp.gt.s32.totalorder %v347_v24, %v344_v34  ;;  %vm351_vm6 = vcmp.gt.s32.totalorder %v347_v24, %v345_v39  ;;  %435 = vmatpush.msrb.mxu2 %v151_v0  ;;  %vm404_vm7 = vcmp.lt.s32.totalorder %v345_v39, 28 }
  0x13   : > { %436 = vmatpush.msrb.mxu2 %v150_v1 }
  0x14   : > { %669 = vmatpush.xpose.msk.msra.mxu0 %vm159_vm0, %v153_v3 }
  0x17   : > { %682 = vmatmul.msk.f32.gmra.mxu2 %vm159_vm0, %v149_v7 }
  0x18   : > { %670 = vmatpush.xpose.msk.msra.mxu0 %vm159_vm0, %v152_v6 }
  0x1b   : > { %671 = vmatmul.msk.f32.vlgmr.msra.gmra.mxu0 %vm159_vm0, %v144_v8 }
  0x1c   : > { %675 = vmatpush.xpose.msk.msrb.mxu0 %vm159_vm0, %v156_v5 }
  0x23   : > { %672 = vmatmul.msk.f32.gmra.mxu0 %vm159_vm0, %v145_v9 }
  0x2b   : > { %673 = vmatmul.msk.f32.gmra.mxu0 %vm159_vm0, %v146_v10 }
  0x33   : > { %674 = vmatmul.msk.f32.gmra.mxu0 %vm159_vm0, %v147_v11 }
  0x92   : > { %v283_v12 = vpop.f32.mrf.mxu2 }
  0x98   : > { %v201_v13 = vpop.f32.mrf.mxu0 }
  0x99   : > { %676 = vmatmul.msk.f32.vlgmr.msrb.gmra.mxu0 %vm159_vm0, %v201_v13 }
  0x9a   : > { %v286_v14 = vpop.f32.mrf.mxu2 }
  0x9b   : > { %683 = vmatpush.xpose.msk.msrb.mxu3 %vm289_vm1, %v286_v14 }
  0x9f   : > { %684 = vmatpush.xpose.msk.msrb.mxu3 %vm289_vm1, %v283_v12 }
  0xa0   : > { %v204_v15 = vpop.f32.mrf.mxu0 }
  0xa1   : > { %677 = vmatmul.msk.f32.vlgmr.msra.gmra.mxu1 %vm159_vm0, %v204_v15 }
  0xa8   : > { %v207_v16 = vpop.f32.mrf.mxu0 }
  0xa9   : > { %678 = vmatmul.msk.f32.gmra.mxu1 %vm159_vm0, %v207_v16 }
  0xb0   : > { %v210_v17 = vpop.f32.mrf.mxu0 }
  0xb1   : > { %679 = vmatmul.msk.f32.vlgmr.msra.gmra.mxu3 %vm159_vm0, %v210_v17 }
  0xb2   : > { %485 = vmatpush.msra.mxu3 %v210_v17 }
  0xb4   : > { %486 = vmatpush.msra.mxu3 %v207_v16 }
  0xb6   : > { %487 = vmatpush.msra.mxu3 %v204_v15  ;;  %v158_v15 = vld [vmem:[%s856_s1 + $0x30] sm:$0xff] }
  0xb8   : > { %488 = vmatpush.msra.mxu3 %v201_v13 }
 0x116   : > { %v245_v18 = vpop.f32.mrf.mxu0 }
 0x117   : > { %685 = vmatmul.msk.f32.vlgmr.msrb.gmra.mxu3 %vm289_vm1, %v245_v18 }
 0x11e   : > { %v248_v19 = vpop.f32.mrf.mxu1 }
 0x11f   : > { %686 = vmatmul.msk.f32.gmra.mxu3 %vm289_vm1, %v248_v19 }
 0x126   : > { %v251_v20 = vpop.f32.mrf.mxu1 }
 0x127   : > { %687 = vmatmul.msk.f32.gmra.mxu3 %vm289_vm1, %v251_v20 }
 0x134   : > { %v254_v21 = vpop.f32.mrf.mxu3 }
 0x135   : > { %688 = vmatmul.msk.f32.gmra.mxu3 %vm289_vm1, %v254_v21 }
 0x13d   : > { %694 = vmatmul.msk.f32.vlgmr.msra.gmra.mxu3 %vm159_vm0, %v158_v15 }
 0x19a   : > { %v325_v25 = vpop.f32.mrf.mxu3 }
 0x19b   : > { %v337_v26 = vmul.f32 0.35355338, %v325_v25 }
 0x19d   : > { %v352_v27 = vsel %vm348_vm2, -1e+30, %v337_v26 }
 0x19e   : > { %v357_v28 = vsel %vm356_vm3, %v352_v27, -inf }
 0x19f   : > { %358 = vmax.xlane.f32.xlu0 %v357_v28 }
 0x1a2   : > { %v328_v30 = vpop.f32.mrf.mxu3 }
 0x1a3   : > { %v338_v31 = vmul.f32 0.35355338, %v328_v30 }
 0x1a5   : > { %v353_v32 = vsel %vm349_vm4, -1e+30, %v338_v31 }
 0x1a6   : > { %v360_v33 = vsel %vm356_vm3, %v353_v32, -inf }
 0x1a7   : > { %361 = vmax.xlane.f32.xlu0 %v360_v33 }
 0x1aa   : > { %v331_v35 = vpop.f32.mrf.mxu3 }
 0x1ab   : > { %v339_v36 = vmul.f32 0.35355338, %v331_v35 }
 0x1ad   : > { %v354_v37 = vsel %vm350_vm5, -1e+30, %v339_v36 }
 0x1ae   : > { %v363_v38 = vsel %vm356_vm3, %v354_v37, -inf }
 0x1af   : > { %364 = vmax.xlane.f32.xlu1 %v363_v38 }
 0x1b8   : > { %v334_v40 = vpop.f32.mrf.mxu3 }
 0x1b9   : > { %v340_v41 = vmul.f32 0.35355338, %v334_v40 }
 0x1bb   : > { %v355_v42 = vsel %vm351_vm6, -1e+30, %v340_v41 }
 0x1bc   : > { %v366_v43 = vsel %vm356_vm3, %v355_v42, -inf }
 0x1bd   : > { %367 = vmax.xlane.f32.xlu1 %v366_v43 }
 0x1c0   : > { %v490_v20 = vpop.f32.mrf.mxu3 }
 0x212   : > { %v359_v44 = vpop.xlane.xlu0 %358 }
 0x213   : > { %v369_v45 = vsub.f32 %v352_v27, %v359_v44 }
 0x215   : > { %v373_v46 = vmul.f32 1.442695, %v369_v45 }
 0x217   : > { %715 = vpow2.f32 %v373_v46 }
 0x21a   : > { %v362_v47 = vpop.xlane.xlu0 %361 }
 0x21b   : > { %v370_v48 = vsub.f32 %v353_v32, %v362_v47 }
 0x21d   : > { %v716_v49 = vpop.eup %715  ;;  %v375_v50 = vmul.f32 1.442695, %v370_v48 }
 0x21e   : > { %v381_v51 = vsel %vm356_vm3, %v716_v49, 0.0 }
 0x21f   : > { %717 = vpow2.f32 %v375_v50  ;;  %382 = vadd.xlane.f32.xlu2 %v381_v51 }
 0x222   : > { %v365_v52 = vpop.xlane.xlu1 %364 }
 0x223   : > { %v371_v53 = vsub.f32 %v354_v37, %v365_v52 }
 0x225   : > { %v718_v54 = vpop.eup %717  ;;  %v377_v55 = vmul.f32 1.442695, %v371_v53 }
 0x226   : > { %v384_v56 = vsel %vm356_vm3, %v718_v54, 0.0 }
 0x227   : > { %719 = vpow2.f32 %v377_v55  ;;  %385 = vadd.xlane.f32.xlu2 %v384_v56 }
 0x22d   : > { %v720_v57 = vpop.eup %719 }
 0x22e   : > { %v387_v58 = vsel %vm356_vm3, %v720_v57, 0.0 }
 0x22f   : > { %388 = vadd.xlane.f32.xlu0 %v387_v58 }
 0x230   : > { %v368_v59 = vpop.xlane.xlu1 %367 }
 0x231   : > { %v372_v60 = vsub.f32 %v355_v42, %v368_v59 }
 0x233   : > { %v379_v61 = vmul.f32 1.442695, %v372_v60 }
 0x235   : > { %721 = vpow2.f32 %v379_v61 }
 0x23b   : > { %v722_v62 = vpop.eup %721 }
 0x23c   : > { %v390_v63 = vsel %vm356_vm3, %v722_v62, 0.0 }
 0x23d   : > { %391 = vadd.xlane.f32.xlu1 %v390_v63 }
 0x258   : > { %566 = vxpose.xlu0.b32.start.end [1/1] (short) (narrow) %v490_v20, 32 }
 0x292   : > { %v383_v2 = vpop.xlane.xlu2 %382 }
 0x293   : > { %723 = vrcp.f32 %v383_v2 }
 0x299   : > { %v724_v3 = vpop.eup %723 }
 0x29a   : > { %v386_v4 = vpop.xlane.xlu2 %385  ;;  %v397_v5 = vmul.f32 %v724_v3, %v716_v49 }
 0x29b   : > { %725 = vrcp.f32 %v386_v4 }
 0x29c   : > { %689 = vmatmul.msk.f32.vlgmr.msrb.gmra.mxu2 %vm356_vm3, %v397_v5 }
 0x2a1   : > { %v726_v6 = vpop.eup %725 }
 0x2a2   : > { %v389_v7 = vpop.xlane.xlu0 %388  ;;  %v398_v8 = vmul.f32 %v726_v6, %v718_v54 }
 0x2a3   : > { %727 = vrcp.f32 %v389_v7 }
 0x2a4   : > { %690 = vmatmul.msk.f32.gmra.mxu2 %vm356_vm3, %v398_v8 }
 0x2a9   : > { %v728_v9 = vpop.eup %727 }
 0x2aa   : > { %v399_v10 = vmul.f32 %v728_v9, %v720_v57 }
 0x2ac   : > { %691 = vmatmul.msk.f32.gmra.mxu2 %vm356_vm3, %v399_v10 }
 0x2b0   : > { %v392_v11 = vpop.xlane.xlu1 %391 }
 0x2b1   : > { %729 = vrcp.f32 %v392_v11 }
 0x2b7   : > { %v730_v12 = vpop.eup %729 }
 0x2b8   : > { %v400_v13 = vmul.f32 %v730_v12, %v722_v62 }
 0x2ba   : > { %v408_v14 = vsel %vm404_vm7, %v400_v13, 0.0 }
 0x2bb   : > { %692 = vmatmul.msk.f32.gmra.mxu2 %vm356_vm3, %v408_v14 }
 0x2fc   : > { %v582_v22 = vpop.trf.xlu0 }
 0x304   : > { %v583_v23 = vpop.trf.xlu0 }
 0x30c   : > { %v584_v24 = vpop.trf.xlu0 }
 0x30d   : > { %602 = vst.msk [vmem:[%s143_s4 + $0x20] sm:$0xff] %vm289_vm1, %v584_v24 }
 0x314   : > { %v585_v26 = vpop.trf.xlu0 }
 0x315   : > { %603 = vst.msk [vmem:[%s143_s4 + $0x28] sm:$0xff] %vm289_vm1, %v585_v26 }
 0x31f   : > { %v438_v16 = vpop.f32.mrf.mxu2 }
 0x327   : > { %v441_v17 = vpop.f32.mrf.mxu2 }
 0x32f   : > { %v444_v18 = vpop.f32.mrf.mxu2 }
 0x33e   : > { %v447_v19 = vpop.f32.mrf.mxu2 }
 0x33f   : > { %465 = vmatpush.msrb.mxu1 %v447_v19 }
 0x341   : > { %466 = vmatpush.msrb.mxu1 %v444_v18 }
 0x343   : > { %467 = vmatpush.msrb.mxu1 %v441_v17 }
 0x345   : > { %468 = vmatpush.msrb.mxu1 %v438_v16 }
 0x346   : > { %693 = vmatmul.msk.f32.vlgmr.msrb.gmra.mxu1 %vm159_vm0, %v158_v15 }
 0x347   : > { %695 = vmatpush.xpose.msk.msra.mxu1 %vm159_vm0, %v158_v15 }
 0x34e   : > { %696 = vmatmul.msk.f32.vlgmr.msra.gmra.mxu1 %vm159_vm0, %v438_v16 }
 0x356   : > { %697 = vmatmul.msk.f32.gmra.mxu1 %vm159_vm0, %v441_v17 }
 0x35e   : > { %698 = vmatmul.msk.f32.gmra.mxu1 %vm159_vm0, %v444_v18 }
 0x366   : > { %699 = vmatmul.msk.f32.gmra.mxu1 %vm159_vm0, %v447_v19 }
 0x3c3   : > { %v470_v21 = vpop.f32.mrf.mxu1 }
 0x3c4   : > { %493 = vxpose.xlu2.b32.start.end [1/1] (short) (narrow) %v470_v21, 32 }
 0x3cb   : > { %v554_v25 = vpop.f32.mrf.mxu1 }
 0x3d3   : > { %v557_v29 = vpop.f32.mrf.mxu1 }
 0x3db   : > { %v560_v32 = vpop.f32.mrf.mxu1 }
 0x3e3   : > { %v563_v35 = vpop.f32.mrf.mxu1 }
 0x45d   : > { %v509_v27 = vpop.trf.xlu2 }
 0x45e   : > { %v555_v28 = vadd.f32 %v554_v25, %v509_v27 }
 0x460   : > { %598 = vst.msk [vmem:[%s143_s4] sm:$0xff] %vm289_vm1, %v555_v28 }
 0x465   : > { %v510_v30 = vpop.trf.xlu2 }
 0x466   : > { %v558_v31 = vadd.f32 %v557_v29, %v510_v30 }
 0x468   : > { %599 = vst.msk [vmem:[%s143_s4 + $0x8] sm:$0xff] %vm289_vm1, %v558_v31 }
 0x46d   : > { %v511_v33 = vpop.trf.xlu2 }
 0x46e   : > { %v561_v34 = vadd.f32 %v560_v32, %v511_v33 }
 0x470   : > { %600 = vst.msk [vmem:[%s143_s4 + $0x10] sm:$0xff] %vm289_vm1, %v561_v34 }
 0x475   : > { %v512_v36 = vpop.trf.xlu2 }
 0x476   : > { %v564_v37 = vadd.f32 %v563_v35, %v512_v36 }
 0x478   : > { %601 = vst.msk [vmem:[%s143_s4 + $0x18] sm:$0xff] %vm289_vm1, %v564_v37 }
 0x479 PF: > { %s12_s9 = sadd.s32 1, %s737_s9  }
 0x47a   : > { %p9_p4 = scmp.ge.s32.totalorder %s12_s9, 6  }
 0x47c   :  { %11 = sbr.rel (!%p9_p4) target bundleno = 1 (0x1), region = 58 }

</bundles_post_ra>
